<compile_context>
chip_gen: v5e
topology: v5e:2x2
jax: 0.10.0
libtpu: 0.0.40
codegen_flags: <defaults>
</compile_context>

<pallas_src>
import functools

import jax
import jax.numpy as jnp
from jax.experimental import pallas as pl
from jax.experimental.pallas import tpu as pltpu

INPUT_DIM = 28 * 28    # 784
HIDDEN_DIM = 100
OUTPUT_DIM = 10

PAD_HIDDEN = 128       # 100 -> 128 (lane-aligned MXU tiles)
PAD_OUT = 128          # 10  -> 128 (lane-dense output stores, no masked vst.msk)


def _cdiv(a, b):
    return -(-a // b)


def _round_up(x, m):
    return ((x + m - 1) // m) * m


# ------------------------------- kernel body ---------------------------------
def _mlp_kernel(x_ref,
                w1_ref, b1_ref,
                w2_ref, b2_ref,
                w3_ref, b3_ref,
                w4_ref, b4_ref,
                o_ref):
    """One batch tile: 4 fused Linear(+ReLU) layers; intermediates stay in VMEM/vregs."""
    cd = w1_ref.dtype                         # matmul operand dtype (bf16 or f32)
    x = x_ref[...].astype(cd)                 # in-kernel cast, hidden under the x DMA
    # fc1 + relu  (f32 accumulation on the MXU, f32 bias/ReLU on the VPU)
    h = jnp.dot(x, w1_ref[...], preferred_element_type=jnp.float32)
    h = jnp.maximum(h + b1_ref[...], 0.0)
    # fc2 + relu
    h = jnp.dot(h.astype(cd), w2_ref[...], preferred_element_type=jnp.float32)
    h = jnp.maximum(h + b2_ref[...], 0.0)
    # fc3 + relu
    h = jnp.dot(h.astype(cd), w3_ref[...], preferred_element_type=jnp.float32)
    h = jnp.maximum(h + b3_ref[...], 0.0)
    # fc4 (no activation); store lane-dense padded slab in o_ref.dtype
    h = jnp.dot(h.astype(cd), w4_ref[...], preferred_element_type=jnp.float32)
    o_ref[...] = (h + b4_ref[...]).astype(o_ref.dtype)


# ----------------------------- parameter prep --------------------------------
def _pad2(a, rows, cols):
    return jnp.pad(a, ((0, rows - a.shape[0]), (0, cols - a.shape[1])))


def prepare_params(params, compute_dtype=jnp.bfloat16):
    """Pad feature dims to 128 lanes and cast weights to the matmul-operand dtype ONCE.

    params: [(w1,b1),...,(w4,b4)], w_l in (in, out) layout, b_l in (1, out).
    Biases stay f32 (bias-add / ReLU are always f32). Zero padding is mathematically
    inert; the forward slices the 128-wide output back to 10 columns.
    """
    (w1, b1), (w2, b2), (w3, b3), (w4, b4) = params
    return (
        _pad2(w1, INPUT_DIM, PAD_HIDDEN).astype(compute_dtype),
        _pad2(b1, 1, PAD_HIDDEN).astype(jnp.float32),
        _pad2(w2, PAD_HIDDEN, PAD_HIDDEN).astype(compute_dtype),
        _pad2(b2, 1, PAD_HIDDEN).astype(jnp.float32),
        _pad2(w3, PAD_HIDDEN, PAD_HIDDEN).astype(compute_dtype),
        _pad2(b3, 1, PAD_HIDDEN).astype(jnp.float32),
        _pad2(w4, PAD_HIDDEN, PAD_OUT).astype(compute_dtype),
        _pad2(b4, 1, PAD_OUT).astype(jnp.float32),
    )


# ------------------------------- tile choice ----------------------------------
def _choose_tile(B, tb_max):
    """Pick the batch tile so that:
       * the grid has >= 2 steps whenever the batch allows it (v7x megacore),
       * the padded tail is bounded to < 8 rows per grid step,
       * the tile never exceeds tb_max (VMEM headroom on v5e/v7x)."""
    n_steps = max(_cdiv(B, tb_max), 2 if B >= 16 else 1)
    tb = min(_round_up(_cdiv(B, n_steps), 8), _round_up(tb_max, 8))
    return max(tb, 8)


def _rep_spec(shape, single_buffer):
    """Weight/bias block: full array, block-invariant across the batch grid."""
    n = len(shape)
    idx = lambda i, _n=n: (0,) * _n
    if single_buffer:
        # Block index never changes -> a single VMEM buffer suffices (no useless
        # double-buffer DMA plumbing, halves the weight VMEM footprint).
        return pl.BlockSpec(shape, idx, pipeline_mode=pl.Buffered(1))
    return pl.BlockSpec(shape, idx)


# --------------------------------- forward -----------------------------------
@functools.partial(
    jax.jit,
    static_argnames=("tb_max", "single_buffer_weights", "vmem_limit_bytes"))
def _ffnn_forward_impl(x, prepared, *, tb_max=1024, single_buffer_weights=True,
                       vmem_limit_bytes=None):
    w1p, b1p, w2p, b2p, w3p, b3p, w4p, b4p = prepared
    B = x.shape[0]

    tb = _choose_tile(B, tb_max)
    B_pad = _round_up(B, tb)
    x_p = jnp.pad(x, ((0, B_pad - B), (0, 0))) if B_pad != B else x
    grid = (B_pad // tb,)

    compute_dtype = w1p.dtype
    out_dtype = jnp.bfloat16 if compute_dtype == jnp.bfloat16 else jnp.float32

    flops = 2 * B_pad * (INPUT_DIM * PAD_HIDDEN
                         + 2 * PAD_HIDDEN * PAD_HIDDEN
                         + PAD_HIDDEN * PAD_OUT)
    bytes_accessed = int(
        B_pad * INPUT_DIM * x_p.dtype.itemsize                       # x stream
        + sum(int(a.size) * a.dtype.itemsize for a in prepared)      # weights once
        + B_pad * PAD_OUT * jnp.dtype(out_dtype).itemsize)           # writeback

    out_padded = pl.pallas_call(
        _mlp_kernel,
        out_shape=jax.ShapeDtypeStruct((B_pad, PAD_OUT), out_dtype),
        grid_spec=pltpu.PrefetchScalarGridSpec(
            num_scalar_prefetch=0,
            grid=grid,
            in_specs=[
                pl.BlockSpec((tb, INPUT_DIM), lambda i: (i, 0)),   # K=784 unpadded
                _rep_spec(w1p.shape, single_buffer_weights),
                _rep_spec(b1p.shape, single_buffer_weights),
                _rep_spec(w2p.shape, single_buffer_weights),
                _rep_spec(b2p.shape, single_buffer_weights),
                _rep_spec(w3p.shape, single_buffer_weights),
                _rep_spec(b3p.shape, single_buffer_weights),
                _rep_spec(w4p.shape, single_buffer_weights),
                _rep_spec(b4p.shape, single_buffer_weights),
            ],
            out_specs=pl.BlockSpec((tb, PAD_OUT), lambda i: (i, 0)),
        ),
        compiler_params=pltpu.CompilerParams(
            dimension_semantics=("parallel",),      # batch grid shards across v7x TCs
            vmem_limit_bytes=vmem_limit_bytes,      # tb<=1024 fits all scoped defaults
        ),
        cost_estimate=pl.CostEstimate(
            flops=int(flops), transcendentals=0, bytes_accessed=bytes_accessed),
    )(x_p, w1p, b1p, w2p, b2p, w3p, b3p, w4p, b4p)

    # slice away batch padding and the 10 -> 128 output padding; return f32
    return out_padded[:B, :OUTPUT_DIM].astype(jnp.float32)


def ffnn_forward(x, prepared, *, tb_max=1024, vmem_limit_bytes=None):
    """x: (B, 784) float32, prepared = prepare_params(params, dtype) -> (B, 10) float32.

    Tries single-buffered weight BlockSpecs first; transparently falls back to the
    default double-buffered specs if this JAX build rejects pl.Buffered(1) here.
    """
    try:
        return _ffnn_forward_impl(x, prepared, tb_max=tb_max,
                                  single_buffer_weights=True,
                                  vmem_limit_bytes=vmem_limit_bytes)
    except Exception:
        return _ffnn_forward_impl(x, prepared, tb_max=tb_max,
                                  single_buffer_weights=False,
                                  vmem_limit_bytes=vmem_limit_bytes)


# ------------------------------ init / reference ------------------------------
def init_params(key):
    """Deterministic init mimicking nn.Linear's uniform(-1/sqrt(fan_in), ...).

    Weights are created in PyTorch's (out, in) layout and transposed to (in, out)
    so the kernel computes y = x @ W + b. Biases kept 2D (1, out).
    """
    dims = [(INPUT_DIM, HIDDEN_DIM),
            (HIDDEN_DIM, HIDDEN_DIM),
            (HIDDEN_DIM, HIDDEN_DIM),
            (HIDDEN_DIM, OUTPUT_DIM)]
    params = []
    for (fan_in, fan_out) in dims:
        key, kw, kb = jax.random.split(key, 3)
        bound = 1.0 / jnp.sqrt(jnp.float32(fan_in))
        w_torch = jax.random.uniform(kw, (fan_out, fan_in), jnp.float32,
                                     minval=-bound, maxval=bound)
        b = jax.random.uniform(kb, (1, fan_out), jnp.float32,
                               minval=-bound, maxval=bound)
        params.append((w_torch.T, b))   # (in, out) layout for x @ W
    return params


def ffnn_reference(x, params):
    h = x
    for i, (w, b) in enumerate(params):
        h = h @ w + b
        if i < len(params) - 1:
            h = jnp.maximum(h, 0.0)
    return h


if __name__ == "__main__":
    key = jax.random.PRNGKey(0)
    kx, kp = jax.random.split(key)
    params = init_params(kp)

    B = 8
    x = jax.random.normal(kx, (B, INPUT_DIM), jnp.float32)
    ref = ffnn_reference(x, params)

    # bf16 operand path (default; recommended on v5e/v6e/v7x) -- relaxed tolerance
    prep_bf16 = prepare_params(params, jnp.bfloat16)
    out_bf16 = jax.block_until_ready(ffnn_forward(x, prep_bf16))
    assert out_bf16.shape == (B, OUTPUT_DIM)
    assert jnp.allclose(out_bf16, ref, atol=5e-2, rtol=5e-2)

    # f32 operand path -- exact check
    prep_f32 = prepare_params(params, jnp.float32)
    out_f32 = jax.block_until_ready(ffnn_forward(x, prep_f32))
    assert out_f32.shape == (B, OUTPUT_DIM)
    assert jnp.allclose(out_f32, ref, atol=1e-4, rtol=1e-4)

    # multi-step grid + bounded batch padding (B=600, tb_max=512 -> 2 tiles of 304 rows)
    kx2, _ = jax.random.split(kx)
    B2 = 600
    x2 = jax.random.normal(kx2, (B2, INPUT_DIM), jnp.float32)
    out2 = jax.block_until_ready(ffnn_forward(x2, prep_bf16, tb_max=512))
    ref2 = ffnn_reference(x2, params)
    assert out2.shape == (B2, OUTPUT_DIM)
    assert jnp.allclose(out2, ref2, atol=5e-2, rtol=5e-2)

    print("KERNEL_OK")
</pallas_src>

<mosaic_0001>
module attributes {stable_mosaic.version = 11 : i64} {
  func.func @_mlp_kernel(%arg0: i32, %arg1: memref<8x784xf32, #tpu.memory_space<vmem>>, %arg2: memref<784x128xbf16, #tpu.memory_space<vmem>>, %arg3: memref<1x128xf32, #tpu.memory_space<vmem>>, %arg4: memref<128x128xbf16, #tpu.memory_space<vmem>>, %arg5: memref<1x128xf32, #tpu.memory_space<vmem>>, %arg6: memref<128x128xbf16, #tpu.memory_space<vmem>>, %arg7: memref<1x128xf32, #tpu.memory_space<vmem>>, %arg8: memref<128x128xbf16, #tpu.memory_space<vmem>>, %arg9: memref<1x128xf32, #tpu.memory_space<vmem>>, %arg10: memref<8x128xbf16, #tpu.memory_space<vmem>>) attributes {dimension_semantics = [#tpu.dimension_semantics<parallel>], iteration_bounds = array<i64: 1>, scalar_prefetch = 0 : i64, scratch_operands = 0 : i64, tpu.core_type = #tpu.core_type<tc>, window_params = [{transform_indices = @transform_0, window_bounds = array<i64: 8, 784>}, {pipeline_mode = #tpu.pipeline_mode<synchronous>, transform_indices = @transform_1, window_bounds = array<i64: 784, 128>}, {pipeline_mode = #tpu.pipeline_mode<synchronous>, transform_indices = @transform_2, window_bounds = array<i64: 1, 128>}, {pipeline_mode = #tpu.pipeline_mode<synchronous>, transform_indices = @transform_3, window_bounds = array<i64: 128, 128>}, {pipeline_mode = #tpu.pipeline_mode<synchronous>, transform_indices = @transform_4, window_bounds = array<i64: 1, 128>}, {pipeline_mode = #tpu.pipeline_mode<synchronous>, transform_indices = @transform_5, window_bounds = array<i64: 128, 128>}, {pipeline_mode = #tpu.pipeline_mode<synchronous>, transform_indices = @transform_6, window_bounds = array<i64: 1, 128>}, {pipeline_mode = #tpu.pipeline_mode<synchronous>, transform_indices = @transform_7, window_bounds = array<i64: 128, 128>}, {pipeline_mode = #tpu.pipeline_mode<synchronous>, transform_indices = @transform_8, window_bounds = array<i64: 1, 128>}, {transform_indices = @transform_9, window_bounds = array<i64: 8, 128>}]} {
    %c0 = arith.constant 0 : index
    %c0_0 = arith.constant 0 : index
    %0 = vector.load %arg1[%c0, %c0_0] : memref<8x784xf32, #tpu.memory_space<vmem>>, vector<8x784xf32>
    %1 = arith.truncf %0 : vector<8x784xf32> to vector<8x784xbf16>
    %c0_1 = arith.constant 0 : index
    %c0_2 = arith.constant 0 : index
    %2 = vector.load %arg2[%c0_1, %c0_2] : memref<784x128xbf16, #tpu.memory_space<vmem>>, vector<784x128xbf16>
    %cst = arith.constant dense<0.000000e+00> : vector<8x128xf32>
    %3 = tpu.matmul %1, %2, %cst {dimension_numbers = #tpu.dot_dimension_numbers<[1], [0], [0], [1], [0, 0, 1, 1], [], []>} : vector<8x784xbf16>, vector<784x128xbf16>, vector<8x128xf32> -> vector<8x128xf32>
    %c0_3 = arith.constant 0 : index
    %c0_4 = arith.constant 0 : index
    %4 = vector.load %arg3[%c0_3, %c0_4] : memref<1x128xf32, #tpu.memory_space<vmem>>, vector<1x128xf32>
    %5 = vector.broadcast %4 : vector<1x128xf32> to vector<8x128xf32>
    %6 = arith.addf %3, %5 : vector<8x128xf32>
    %cst_5 = arith.constant 0.000000e+00 : f32
    %7 = vector.broadcast %cst_5 : f32 to vector<8x128xf32>
    %8 = arith.maximumf %6, %7 : vector<8x128xf32>
    %9 = arith.truncf %8 : vector<8x128xf32> to vector<8x128xbf16>
    %c0_6 = arith.constant 0 : index
    %c0_7 = arith.constant 0 : index
    %10 = vector.load %arg4[%c0_6, %c0_7] : memref<128x128xbf16, #tpu.memory_space<vmem>>, vector<128x128xbf16>
    %cst_8 = arith.constant dense<0.000000e+00> : vector<8x128xf32>
    %11 = tpu.matmul %9, %10, %cst_8 {dimension_numbers = #tpu.dot_dimension_numbers<[1], [0], [0], [1], [0, 0, 1, 1], [], []>} : vector<8x128xbf16>, vector<128x128xbf16>, vector<8x128xf32> -> vector<8x128xf32>
    %c0_9 = arith.constant 0 : index
    %c0_10 = arith.constant 0 : index
    %12 = vector.load %arg5[%c0_9, %c0_10] : memref<1x128xf32, #tpu.memory_space<vmem>>, vector<1x128xf32>
    %13 = vector.broadcast %12 : vector<1x128xf32> to vector<8x128xf32>
    %14 = arith.addf %11, %13 : vector<8x128xf32>
    %cst_11 = arith.constant 0.000000e+00 : f32
    %15 = vector.broadcast %cst_11 : f32 to vector<8x128xf32>
    %16 = arith.maximumf %14, %15 : vector<8x128xf32>
    %17 = arith.truncf %16 : vector<8x128xf32> to vector<8x128xbf16>
    %c0_12 = arith.constant 0 : index
    %c0_13 = arith.constant 0 : index
    %18 = vector.load %arg6[%c0_12, %c0_13] : memref<128x128xbf16, #tpu.memory_space<vmem>>, vector<128x128xbf16>
    %cst_14 = arith.constant dense<0.000000e+00> : vector<8x128xf32>
    %19 = tpu.matmul %17, %18, %cst_14 {dimension_numbers = #tpu.dot_dimension_numbers<[1], [0], [0], [1], [0, 0, 1, 1], [], []>} : vector<8x128xbf16>, vector<128x128xbf16>, vector<8x128xf32> -> vector<8x128xf32>
    %c0_15 = arith.constant 0 : index
    %c0_16 = arith.constant 0 : index
    %20 = vector.load %arg7[%c0_15, %c0_16] : memref<1x128xf32, #tpu.memory_space<vmem>>, vector<1x128xf32>
    %21 = vector.broadcast %20 : vector<1x128xf32> to vector<8x128xf32>
    %22 = arith.addf %19, %21 : vector<8x128xf32>
    %cst_17 = arith.constant 0.000000e+00 : f32
    %23 = vector.broadcast %cst_17 : f32 to vector<8x128xf32>
    %24 = arith.maximumf %22, %23 : vector<8x128xf32>
    %25 = arith.truncf %24 : vector<8x128xf32> to vector<8x128xbf16>
    %c0_18 = arith.constant 0 : index
    %c0_19 = arith.constant 0 : index
    %26 = vector.load %arg8[%c0_18, %c0_19] : memref<128x128xbf16, #tpu.memory_space<vmem>>, vector<128x128xbf16>
    %cst_20 = arith.constant dense<0.000000e+00> : vector<8x128xf32>
    %27 = tpu.matmul %25, %26, %cst_20 {dimension_numbers = #tpu.dot_dimension_numbers<[1], [0], [0], [1], [0, 0, 1, 1], [], []>} : vector<8x128xbf16>, vector<128x128xbf16>, vector<8x128xf32> -> vector<8x128xf32>
    %c0_21 = arith.constant 0 : index
    %c0_22 = arith.constant 0 : index
    %28 = vector.load %arg9[%c0_21, %c0_22] : memref<1x128xf32, #tpu.memory_space<vmem>>, vector<1x128xf32>
    %29 = vector.broadcast %28 : vector<1x128xf32> to vector<8x128xf32>
    %30 = arith.addf %27, %29 : vector<8x128xf32>
    %31 = arith.truncf %30 : vector<8x128xf32> to vector<8x128xbf16>
    %c0_23 = arith.constant 0 : index
    %c0_24 = arith.constant 0 : index
    %32 = vector.load %arg10[%c0_23, %c0_24] : memref<8x128xbf16, #tpu.memory_space<vmem>>, vector<8x128xbf16>
    tpu.vector_store %arg10[%c0_23, %c0_24], %31 {strides = array<i32>} : memref<8x128xbf16, #tpu.memory_space<vmem>>, vector<8x128xbf16>,
    return
  }
  func.func @transform_0(%arg0: i32) -> (i32, i32) {
    %c0_i32 = arith.constant 0 : i32
    %c0_i32_0 = arith.constant 0 : i32
    return %arg0, %c0_i32 : i32, i32
  }
  func.func @transform_1(%arg0: i32) -> (i32, i32) {
    %c0_i32 = arith.constant 0 : i32
    %c0_i32_0 = arith.constant 0 : i32
    %c0_i32_1 = arith.constant 0 : i32
    return %c0_i32, %c0_i32_0 : i32, i32
  }
  func.func @transform_2(%arg0: i32) -> (i32, i32) {
    %c0_i32 = arith.constant 0 : i32
    %c0_i32_0 = arith.constant 0 : i32
    %c0_i32_1 = arith.constant 0 : i32
    return %c0_i32, %c0_i32_0 : i32, i32
  }
  func.func @transform_3(%arg0: i32) -> (i32, i32) {
    %c0_i32 = arith.constant 0 : i32
    %c0_i32_0 = arith.constant 0 : i32
    %c0_i32_1 = arith.constant 0 : i32
    return %c0_i32, %c0_i32_0 : i32, i32
  }
  func.func @transform_4(%arg0: i32) -> (i32, i32) {
    %c0_i32 = arith.constant 0 : i32
    %c0_i32_0 = arith.constant 0 : i32
    %c0_i32_1 = arith.constant 0 : i32
    return %c0_i32, %c0_i32_0 : i32, i32
  }
  func.func @transform_5(%arg0: i32) -> (i32, i32) {
    %c0_i32 = arith.constant 0 : i32
    %c0_i32_0 = arith.constant 0 : i32
    %c0_i32_1 = arith.constant 0 : i32
    return %c0_i32, %c0_i32_0 : i32, i32
  }
  func.func @transform_6(%arg0: i32) -> (i32, i32) {
    %c0_i32 = arith.constant 0 : i32
    %c0_i32_0 = arith.constant 0 : i32
    %c0_i32_1 = arith.constant 0 : i32
    return %c0_i32, %c0_i32_0 : i32, i32
  }
  func.func @transform_7(%arg0: i32) -> (i32, i32) {
    %c0_i32 = arith.constant 0 : i32
    %c0_i32_0 = arith.constant 0 : i32
    %c0_i32_1 = arith.constant 0 : i32
    return %c0_i32, %c0_i32_0 : i32, i32
  }
  func.func @transform_8(%arg0: i32) -> (i32, i32) {
    %c0_i32 = arith.constant 0 : i32
    %c0_i32_0 = arith.constant 0 : i32
    %c0_i32_1 = arith.constant 0 : i32
    return %c0_i32, %c0_i32_0 : i32, i32
  }
  func.func @transform_9(%arg0: i32) -> (i32, i32) {
    %c0_i32 = arith.constant 0 : i32
    %c0_i32_0 = arith.constant 0 : i32
    return %arg0, %c0_i32 : i32, i32
  }
}

module attributes {stable_mosaic.version = 11 : i64} {
  func.func @_mlp_kernel(%arg0: i32, %arg1: memref<8x784xf32, #tpu.memory_space<vmem>>, %arg2: memref<784x128xbf16, #tpu.memory_space<vmem>>, %arg3: memref<1x128xf32, #tpu.memory_space<vmem>>, %arg4: memref<128x128xbf16, #tpu.memory_space<vmem>>, %arg5: memref<1x128xf32, #tpu.memory_space<vmem>>, %arg6: memref<128x128xbf16, #tpu.memory_space<vmem>>, %arg7: memref<1x128xf32, #tpu.memory_space<vmem>>, %arg8: memref<128x128xbf16, #tpu.memory_space<vmem>>, %arg9: memref<1x128xf32, #tpu.memory_space<vmem>>, %arg10: memref<8x128xbf16, #tpu.memory_space<vmem>>) attributes {dimension_semantics = [#tpu.dimension_semantics<parallel>], iteration_bounds = array<i64: 1>, scalar_prefetch = 0 : i64, scratch_operands = 0 : i64, tpu.core_type = #tpu.core_type<tc>, window_params = [{transform_indices = @transform_0, window_bounds = array<i64: 8, 784>}, {pipeline_mode = #tpu.pipeline_mode<synchronous>, transform_indices = @transform_1, window_bounds = array<i64: 784, 128>}, {pipeline_mode = #tpu.pipeline_mode<synchronous>, transform_indices = @transform_2, window_bounds = array<i64: 1, 128>}, {pipeline_mode = #tpu.pipeline_mode<synchronous>, transform_indices = @transform_3, window_bounds = array<i64: 128, 128>}, {pipeline_mode = #tpu.pipeline_mode<synchronous>, transform_indices = @transform_4, window_bounds = array<i64: 1, 128>}, {pipeline_mode = #tpu.pipeline_mode<synchronous>, transform_indices = @transform_5, window_bounds = array<i64: 128, 128>}, {pipeline_mode = #tpu.pipeline_mode<synchronous>, transform_indices = @transform_6, window_bounds = array<i64: 1, 128>}, {pipeline_mode = #tpu.pipeline_mode<synchronous>, transform_indices = @transform_7, window_bounds = array<i64: 128, 128>}, {pipeline_mode = #tpu.pipeline_mode<synchronous>, transform_indices = @transform_8, window_bounds = array<i64: 1, 128>}, {transform_indices = @transform_9, window_bounds = array<i64: 8, 128>}]} {
    %c0 = arith.constant 0 : index
    %c0_0 = arith.constant 0 : index
    %0 = vector.load %arg1[%c0, %c0_0] : memref<8x784xf32, #tpu.memory_space<vmem>>, vector<8x784xf32>
    %1 = arith.truncf %0 : vector<8x784xf32> to vector<8x784xbf16>
    %c0_1 = arith.constant 0 : index
    %c0_2 = arith.constant 0 : index
    %2 = vector.load %arg2[%c0_1, %c0_2] : memref<784x128xbf16, #tpu.memory_space<vmem>>, vector<784x128xbf16>
    %cst = arith.constant dense<0.000000e+00> : vector<8x128xf32>
    %3 = tpu.matmul %1, %2, %cst {dimension_numbers = #tpu.dot_dimension_numbers<[1], [0], [0], [1], [0, 0, 1, 1], [], []>} : vector<8x784xbf16>, vector<784x128xbf16>, vector<8x128xf32> -> vector<8x128xf32>
    %c0_3 = arith.constant 0 : index
    %c0_4 = arith.constant 0 : index
    %4 = vector.load %arg3[%c0_3, %c0_4] : memref<1x128xf32, #tpu.memory_space<vmem>>, vector<1x128xf32>
    %5 = vector.broadcast %4 : vector<1x128xf32> to vector<8x128xf32>
    %6 = arith.addf %3, %5 : vector<8x128xf32>
    %cst_5 = arith.constant 0.000000e+00 : f32
    %7 = vector.broadcast %cst_5 : f32 to vector<8x128xf32>
    %8 = arith.maximumf %6, %7 : vector<8x128xf32>
    %9 = arith.truncf %8 : vector<8x128xf32> to vector<8x128xbf16>
    %c0_6 = arith.constant 0 : index
    %c0_7 = arith.constant 0 : index
    %10 = vector.load %arg4[%c0_6, %c0_7] : memref<128x128xbf16, #tpu.memory_space<vmem>>, vector<128x128xbf16>
    %cst_8 = arith.constant dense<0.000000e+00> : vector<8x128xf32>
    %11 = tpu.matmul %9, %10, %cst_8 {dimension_numbers = #tpu.dot_dimension_numbers<[1], [0], [0], [1], [0, 0, 1, 1], [], []>} : vector<8x128xbf16>, vector<128x128xbf16>, vector<8x128xf32> -> vector<8x128xf32>
    %c0_9 = arith.constant 0 : index
    %c0_10 = arith.constant 0 : index
    %12 = vector.load %arg5[%c0_9, %c0_10] : memref<1x128xf32, #tpu.memory_space<vmem>>, vector<1x128xf32>
    %13 = vector.broadcast %12 : vector<1x128xf32> to vector<8x128xf32>
    %14 = arith.addf %11, %13 : vector<8x128xf32>
    %cst_11 = arith.constant 0.000000e+00 : f32
    %15 = vector.broadcast %cst_11 : f32 to vector<8x128xf32>
    %16 = arith.maximumf %14, %15 : vector<8x128xf32>
    %17 = arith.truncf %16 : vector<8x128xf32> to vector<8x128xbf16>
    %c0_12 = arith.constant 0 : index
    %c0_13 = arith.constant 0 : index
    %18 = vector.load %arg6[%c0_12, %c0_13] : memref<128x128xbf16, #tpu.memory_space<vmem>>, vector<128x128xbf16>
    %cst_14 = arith.constant dense<0.000000e+00> : vector<8x128xf32>
    %19 = tpu.matmul %17, %18, %cst_14 {dimension_numbers = #tpu.dot_dimension_numbers<[1], [0], [0], [1], [0, 0, 1, 1], [], []>} : vector<8x128xbf16>, vector<128x128xbf16>, vector<8x128xf32> -> vector<8x128xf32>
    %c0_15 = arith.constant 0 : index
    %c0_16 = arith.constant 0 : index
    %20 = vector.load %arg7[%c0_15, %c0_16] : memref<1x128xf32, #tpu.memory_space<vmem>>, vector<1x128xf32>
    %21 = vector.broadcast %20 : vector<1x128xf32> to vector<8x128xf32>
    %22 = arith.addf %19, %21 : vector<8x128xf32>
    %cst_17 = arith.constant 0.000000e+00 : f32
    %23 = vector.broadcast %cst_17 : f32 to vector<8x128xf32>
    %24 = arith.maximumf %22, %23 : vector<8x128xf32>
    %25 = arith.truncf %24 : vector<8x128xf32> to vector<8x128xbf16>
    %c0_18 = arith.constant 0 : index
    %c0_19 = arith.constant 0 : index
    %26 = vector.load %arg8[%c0_18, %c0_19] : memref<128x128xbf16, #tpu.memory_space<vmem>>, vector<128x128xbf16>
    %cst_20 = arith.constant dense<0.000000e+00> : vector<8x128xf32>
    %27 = tpu.matmul %25, %26, %cst_20 {dimension_numbers = #tpu.dot_dimension_numbers<[1], [0], [0], [1], [0, 0, 1, 1], [], []>} : vector<8x128xbf16>, vector<128x128xbf16>, vector<8x128xf32> -> vector<8x128xf32>
    %c0_21 = arith.constant 0 : index
    %c0_22 = arith.constant 0 : index
    %28 = vector.load %arg9[%c0_21, %c0_22] : memref<1x128xf32, #tpu.memory_space<vmem>>, vector<1x128xf32>
    %29 = vector.broadcast %28 : vector<1x128xf32> to vector<8x128xf32>
    %30 = arith.addf %27, %29 : vector<8x128xf32>
    %31 = arith.truncf %30 : vector<8x128xf32> to vector<8x128xbf16>
    %c0_23 = arith.constant 0 : index
    %c0_24 = arith.constant 0 : index
    %32 = vector.load %arg10[%c0_23, %c0_24] : memref<8x128xbf16, #tpu.memory_space<vmem>>, vector<8x128xbf16>
    tpu.vector_store %arg10[%c0_23, %c0_24], %31 {strides = array<i32>} : memref<8x128xbf16, #tpu.memory_space<vmem>>, vector<8x128xbf16>,
    return
  }
  func.func @transform_0(%arg0: i32) -> (i32, i32) {
    %c0_i32 = arith.constant 0 : i32
    %c0_i32_0 = arith.constant 0 : i32
    return %arg0, %c0_i32 : i32, i32
  }
  func.func @transform_1(%arg0: i32) -> (i32, i32) {
    %c0_i32 = arith.constant 0 : i32
    %c0_i32_0 = arith.constant 0 : i32
    %c0_i32_1 = arith.constant 0 : i32
    return %c0_i32, %c0_i32_0 : i32, i32
  }
  func.func @transform_2(%arg0: i32) -> (i32, i32) {
    %c0_i32 = arith.constant 0 : i32
    %c0_i32_0 = arith.constant 0 : i32
    %c0_i32_1 = arith.constant 0 : i32
    return %c0_i32, %c0_i32_0 : i32, i32
  }
  func.func @transform_3(%arg0: i32) -> (i32, i32) {
    %c0_i32 = arith.constant 0 : i32
    %c0_i32_0 = arith.constant 0 : i32
    %c0_i32_1 = arith.constant 0 : i32
    return %c0_i32, %c0_i32_0 : i32, i32
  }
  func.func @transform_4(%arg0: i32) -> (i32, i32) {
    %c0_i32 = arith.constant 0 : i32
    %c0_i32_0 = arith.constant 0 : i32
    %c0_i32_1 = arith.constant 0 : i32
    return %c0_i32, %c0_i32_0 : i32, i32
  }
  func.func @transform_5(%arg0: i32) -> (i32, i32) {
    %c0_i32 = arith.constant 0 : i32
    %c0_i32_0 = arith.constant 0 : i32
    %c0_i32_1 = arith.constant 0 : i32
    return %c0_i32, %c0_i32_0 : i32, i32
  }
  func.func @transform_6(%arg0: i32) -> (i32, i32) {
    %c0_i32 = arith.constant 0 : i32
    %c0_i32_0 = arith.constant 0 : i32
    %c0_i32_1 = arith.constant 0 : i32
    return %c0_i32, %c0_i32_0 : i32, i32
  }
  func.func @transform_7(%arg0: i32) -> (i32, i32) {
    %c0_i32 = arith.constant 0 : i32
    %c0_i32_0 = arith.constant 0 : i32
    %c0_i32_1 = arith.constant 0 : i32
    return %c0_i32, %c0_i32_0 : i32, i32
  }
  func.func @transform_8(%arg0: i32) -> (i32, i32) {
    %c0_i32 = arith.constant 0 : i32
    %c0_i32_0 = arith.constant 0 : i32
    %c0_i32_1 = arith.constant 0 : i32
    return %c0_i32, %c0_i32_0 : i32, i32
  }
  func.func @transform_9(%arg0: i32) -> (i32, i32) {
    %c0_i32 = arith.constant 0 : i32
    %c0_i32_0 = arith.constant 0 : i32
    return %arg0, %c0_i32 : i32, i32
  }
}

</mosaic_0001>

<bundles_post_ra>
// kernel: _ffnn_forward_impl.1
= control target key start
LH: loop header
LB: loop body
LE: loop exit
PB: predicated region body
PF: predicated region fallthrough
CT: control target
= control target key end

     0   :  { %14 = vsyncpa [#allocation3], 0  ;;  %s1462_s0 = inlined_call_operand.hbm [shape: f32[8,784], index: 0, kind: input, shape index: {}]   ;;  %s1463_s1 = inlined_call_operand.hbm [shape: bf16[784,128], index: 1, kind: input, shape index: {}]   ;;  %s1464_s2 = inlined_call_operand.vmem [shape: f32[1,128], index: 2, kind: input, shape index: {}]   ;;  %s1465_s3 = inlined_call_operand.hbm [shape: bf16[128,128], index: 3, kind: input, shape index: {}]   ;;  %s1466_s4 = inlined_call_operand.vmem [shape: f32[1,128], index: 4, kind: input, shape index: {}]   ;;  %s1467_s5 = inlined_call_operand.hbm [shape: bf16[128,128], index: 5, kind: input, shape index: {}]   ;;  %s1468_s6 = inlined_call_operand.vmem [shape: f32[1,128], index: 6, kind: input, shape index: {}]   ;;  %s1469_s7 = inlined_call_operand.hbm [shape: bf16[128,128], index: 7, kind: input, shape index: {}]   ;;  %s1470_s8 = inlined_call_operand.vmem [shape: f32[1,128], index: 8, kind: input, shape index: {}]   ;;  %s1471_s9 = inlined_call_operand.vmem [shape: bf16[8,128], index: 9, kind: output, shape index: {}]  }
   0x1   :  { %15 = vsyncpa [#allocation5], 0  ;;  %s32_s11 = sshll.u32 %s1463_s1, 4  ;;  %s33_s11 = int_to_ptr.hbm [resolvable:$true] %s32_s11 }
   0x2   :  { %16 = vsyncpa [#allocation8], 0  ;;  %s1375_s12 = smov [#allocation4]   ;;  %s62_s16 = sshll.u32 %s1467_s5, 4  ;;  %s63_s16 = int_to_ptr.hbm [resolvable:$true] %s62_s16 }
   0x3   :  { %s34_s13 = sshll.u32 %s1375_s12, 4  ;;  %s1376_s17 = smov 64   ;;  %s35_s13 = int_to_ptr.vmem [resolvable:$true] %s34_s13 }
   0x4   :  { %s1377_s18 = smov 4   ;;  %s1378_s19 = smov [#allocation7]  }
   0x5   :  { %40 = dma.hbm_to_vmem [thread:$0]  %s33_s11, 6272, %s35_s13, [#allocation5], %s1376_s17, %s1376_s17, %s1377_s18  }
   0x6   :  { %s64_s20 = sshll.u32 %s1378_s19, 4  ;;  %s22_s23 = sshll.u32 %s1462_s0, 4  ;;  %s65_s20 = int_to_ptr.vmem [resolvable:$true] %s64_s20  ;;  %s23_s23 = int_to_ptr.hbm [resolvable:$true] %s22_s23 }
   0x7   :  { %70 = dma.hbm_to_vmem [thread:$0]  %s63_s16, 1024, %s65_s20, [#allocation8], %s1376_s17, %s1376_s17, %s1377_s18  }
   0x8   :  { %s47_s25 = sshll.u32 %s1465_s3, 4  ;;  %s1379_s26 = smov [#allocation2]   ;;  %s48_s25 = int_to_ptr.hbm [resolvable:$true] %s47_s25 }
   0x9   :  { %s24_s27 = sshll.u32 %s1379_s26, 4  ;;  %s1380_s5 = smov [#allocation6]   ;;  %s25_s27 = int_to_ptr.vmem [resolvable:$true] %s24_s27 }
   0xa   :  { %27 = dma.hbm_to_vmem [thread:$0]  %s23_s23, 896, %s25_s27, [#allocation3]  }
   0xb   :  { %s49_s28 = sshll.u32 %s1380_s5, 4  ;;  %s77_s10 = sshll.u32 %s1469_s7, 4  ;;  %s50_s28 = int_to_ptr.vmem [resolvable:$true] %s49_s28  ;;  %s78_s10 = int_to_ptr.hbm [resolvable:$true] %s77_s10 }
   0xc   :  { %55 = dma.hbm_to_vmem [thread:$0]  %s48_s25, 1024, %s50_s28, [#allocation5], %s1376_s17, %s1376_s17, %s1377_s18  }
   0xd   :  { %s1381_s0 = smov [#allocation9]  }
   0xe   :  { %s79_s11 = sshll.u32 %s1381_s0, 4  ;;  %s80_s11 = int_to_ptr.vmem [resolvable:$true] %s79_s11 }
   0xf   :  { %85 = dma.hbm_to_vmem [thread:$0]  %s78_s10, 1024, %s80_s11, [#allocation8], %s1376_s17, %s1376_s17, %s1377_s18  }
  0x10   :  { %1369 = dma.done.wait [#allocation3], 896  }
  0x11   :  { %1370 = vsyncadd [#allocation3], 4294966400 }
  0x12   :  { %1371 = dma.done.wait [#allocation5], 7296  }
  0x13   :  { %1372 = vsyncadd [#allocation5], 4294960000 }
  0x14   :  { %1373 = dma.done.wait [#allocation8], 2048  }
  0x15   :  { %1374 = vsyncadd [#allocation8], 4294965248  ;;  %v1172_v0 = vld [vmem:[#allocation4 + $0x38] sm:$0xff]  ;;  %v1171_v3 = vld [vmem:[#allocation4 + $0x30] sm:$0xff]  ;;  %vm519_vm0 = vcmask 130048  }
  0x16   :  { %v1180_v1 = vld [vmem:[#allocation4 + $0x78] sm:$0xff]  ;;  %523 = vmatpush.bf16.msra.mxu0 %v1172_v0  ;;  %v1179_v4 = vld [vmem:[#allocation4 + $0x70] sm:$0xff]  ;;  %v1170_v8 = vld [vmem:[#allocation4 + $0x28] sm:$0xff] }
  0x17   :  { %v1188_v2 = vld [vmem:[#allocation4 + $0xb8] sm:$0xff]  ;;  %536 = vmatpush.bf16.msra.mxu1 %v1180_v1  ;;  %v1187_v5 = vld [vmem:[#allocation4 + $0xb0] sm:$0xff]  ;;  %v1178_v9 = vld [vmem:[#allocation4 + $0x68] sm:$0xff] }
  0x18   :  { %549 = vmatpush.bf16.msra.mxu2 %v1188_v2  ;;  %v1196_v6 = vld [vmem:[#allocation4 + $0xf8] sm:$0xff]  ;;  %v1195_v7 = vld [vmem:[#allocation4 + $0xf0] sm:$0xff]  ;;  %v1186_v10 = vld [vmem:[#allocation4 + $0xa8] sm:$0xff] }
  0x19   :  { %562 = vmatpush.bf16.msra.mxu3 %v1196_v6  ;;  %v1194_v11 = vld [vmem:[#allocation4 + $0xe8] sm:$0xff]  ;;  %v1169_v12 = vld [vmem:[#allocation4 + $0x20] sm:$0xff]  ;;  %v1168_v16 = vld [vmem:[#allocation4 + $0x18] sm:$0xff] }
  0x1a   :  { %524 = vmatpush.bf16.msra.mxu0 %v1171_v3  ;;  %v1177_v13 = vld [vmem:[#allocation4 + $0x60] sm:$0xff]  ;;  %v1176_v17 = vld [vmem:[#allocation4 + $0x58] sm:$0xff]  ;;  %v1167_v20 = vld [vmem:[#allocation4 + $0x10] sm:$0xff] }
  0x1b   :  { %537 = vmatpush.bf16.msra.mxu1 %v1179_v4  ;;  %v1185_v14 = vld [vmem:[#allocation4 + $0xa0] sm:$0xff]  ;;  %v1184_v18 = vld [vmem:[#allocation4 + $0x98] sm:$0xff]  ;;  %v1175_v21 = vld [vmem:[#allocation4 + $0x50] sm:$0xff] }
  0x1c   :  { %550 = vmatpush.bf16.msra.mxu2 %v1187_v5  ;;  %v1193_v15 = vld [vmem:[#allocation4 + $0xe0] sm:$0xff]  ;;  %v1192_v19 = vld [vmem:[#allocation4 + $0xd8] sm:$0xff]  ;;  %v1183_v22 = vld [vmem:[#allocation4 + $0x90] sm:$0xff] }
  0x1d   :  { %563 = vmatpush.bf16.msra.mxu3 %v1195_v7  ;;  %v1191_v23 = vld [vmem:[#allocation4 + $0xd0] sm:$0xff]  ;;  %v1166_v24 = vld [vmem:[#allocation4 + $0x8] sm:$0xff]  ;;  %v1165_v27 = vld [vmem:[#allocation4] sm:$0xff] }
  0x1e   :  { %525 = vmatpush.bf16.msra.mxu0 %v1170_v8  ;;  %v1174_v25 = vld [vmem:[#allocation4 + $0x48] sm:$0xff]  ;;  %v1173_v29 = vld [vmem:[#allocation4 + $0x40] sm:$0xff]  ;;  %v110_v31 = vld [vmem:[#allocation2 + $0x8] sm:$0xff] }
  0x1f   :  { %538 = vmatpush.bf16.msra.mxu1 %v1178_v9  ;;  %v1182_v26 = vld [vmem:[#allocation4 + $0x88] sm:$0xff]  ;;  %v1204_v32 = vld [vmem:[#allocation4 + $0x138] sm:$0xff]  ;;  %v1181_v34 = vld [vmem:[#allocation4 + $0x80] sm:$0xff]  ;;  %v117_v37 = vpack.c.bf16 %v110_v31, %v110_v31 }
  0x20   :  { %551 = vmatpush.bf16.msra.mxu2 %v1186_v10  ;;  %v1190_v28 = vld [vmem:[#allocation4 + $0xc8] sm:$0xff]  ;;  %v1212_v33 = vld [vmem:[#allocation4 + $0x178] sm:$0xff]  ;;  %v1189_v38 = vld [vmem:[#allocation4 + $0xc0] sm:$0xff] }
  0x21   :  { %564 = vmatpush.bf16.msra.mxu3 %v1194_v11  ;;  %v109_v30 = vld [vmem:[#allocation2] sm:$0xff]  ;;  %v111_v35 = vld [vmem:[#allocation2 + $0x10] sm:$0xff]  ;;  %v1213_v39 = vld [vmem:[#allocation4 + $0x180] sm:$0xff] }
  0x22   :  { %526 = vmatpush.bf16.msra.mxu0 %v1169_v12  ;;  %v116_v36 = vpack.c.bf16 %v109_v30, %v109_v30  ;;  %v112_v40 = vld [vmem:[#allocation2 + $0x18] sm:$0xff]  ;;  %v1203_v41 = vld [vmem:[#allocation4 + $0x130] sm:$0xff]  ;;  %v118_v43 = vpack.c.bf16 %v111_v35, %v111_v35  ;;  %v1202_v45 = vld [vmem:[#allocation4 + $0x128] sm:$0xff] }
  0x23   :  { %539 = vmatpush.bf16.msra.mxu1 %v1177_v13  ;;  %v1211_v42 = vld [vmem:[#allocation4 + $0x170] sm:$0xff]  ;;  %v119_v44 = vpack.c.bf16 %v112_v40, %v112_v40  ;;  %v1210_v46 = vld [vmem:[#allocation4 + $0x168] sm:$0xff]  ;;  %v1201_v47 = vld [vmem:[#allocation4 + $0x120] sm:$0xff] }
  0x24   :  { %552 = vmatpush.bf16.msra.mxu2 %v1185_v14  ;;  %v1209_v48 = vld [vmem:[#allocation4 + $0x160] sm:$0xff]  ;;  %v1200_v49 = vld [vmem:[#allocation4 + $0x118] sm:$0xff]  ;;  %v1199_v52 = vld [vmem:[#allocation4 + $0x110] sm:$0xff] }
  0x25   :  { %565 = vmatpush.bf16.msra.mxu3 %v1193_v15  ;;  %v1208_v50 = vld [vmem:[#allocation4 + $0x158] sm:$0xff]  ;;  %v1207_v53 = vld [vmem:[#allocation4 + $0x150] sm:$0xff]  ;;  %v1198_v55 = vld [vmem:[#allocation4 + $0x108] sm:$0xff] }
  0x26   :  { %527 = vmatpush.bf16.msra.mxu0 %v1168_v16  ;;  %v115_v51 = vld [vmem:[#allocation2 + $0x30] sm:$0xff]  ;;  %v1206_v56 = vld [vmem:[#allocation4 + $0x148] sm:$0xff]  ;;  %v1197_v57 = vld [vmem:[#allocation4 + $0x100] sm:$0xff] }
  0x27   :  { %540 = vmatpush.bf16.msra.mxu1 %v1176_v17  ;;  %v122_v54 = vpack.c.bf16 %v115_v51, %v115_v51  ;;  %v1205_v58 = vld [vmem:[#allocation4 + $0x140] sm:$0xff]  ;;  %v113_v59 = vld [vmem:[#allocation2 + $0x20] sm:$0xff]  ;;  %v114_v60 = vld [vmem:[#allocation2 + $0x28] sm:$0xff] }
  0x28   :  { %553 = vmatpush.bf16.msra.mxu2 %v1184_v18  ;;  %v120_v61 = vpack.c.bf16 %v113_v59, %v113_v59  ;;  %v121_v62 = vpack.c.bf16 %v114_v60, %v114_v60  ;;  %v1221_v63 = vld [vmem:[#allocation6 + $0x38] sm:$0xff]  ;;  %v1220_v0 = vld [vmem:[#allocation6 + $0x30] sm:$0xff]  ;;  %v1219_v1 = vld [vmem:[#allocation6 + $0x28] sm:$0xff] }
  0x29   :  { %566 = vmatpush.bf16.msra.mxu3 %v1192_v19  ;;  %v1218_v2 = vld [vmem:[#allocation6 + $0x20] sm:$0xff]  ;;  %v1217_v3 = vld [vmem:[#allocation6 + $0x18] sm:$0xff]  ;;  %v1216_v4 = vld [vmem:[#allocation6 + $0x10] sm:$0xff] }
  0x2a   :  { %528 = vmatpush.bf16.msra.mxu0 %v1167_v20  ;;  %v1215_v5 = vld [vmem:[#allocation6 + $0x8] sm:$0xff]  ;;  %v1214_v8 = vld [vmem:[#allocation6] sm:$0xff]  ;;  %v1229_v11 = vld [vmem:[#allocation7 + $0x38] sm:$0xff] }
  0x2b   :  { %541 = vmatpush.bf16.msra.mxu1 %v1175_v21  ;;  %v1228_v14 = vld [vmem:[#allocation7 + $0x30] sm:$0xff]  ;;  %v1245_v15 = vld [vmem:[%s1464_s2] ss:$0 sm:$0xff]  ;;  %v1227_v16 = vld [vmem:[#allocation7 + $0x28] sm:$0xff] }
  0x2c   :  { %554 = vmatpush.bf16.msra.mxu2 %v1183_v22  ;;  %v1226_v20 = vld [vmem:[#allocation7 + $0x20] sm:$0xff]  ;;  %v1225_v22 = vld [vmem:[#allocation7 + $0x18] sm:$0xff]  ;;  %v1236_v40 = vld [vmem:[#allocation9 + $0x30] sm:$0xff] }
  0x2d   :  { %567 = vmatpush.bf16.msra.mxu3 %v1191_v23  ;;  %v1231_v51 = vld [vmem:[#allocation9 + $0x8] sm:$0xff]  ;;  %v1248_v59 = vld [vmem:[%s1470_s8] ss:$0 sm:$0xff] }
  0x2e   :  { %529 = vmatpush.bf16.msra.mxu0 %v1166_v24 }
  0x2f   :  { %542 = vmatpush.bf16.msra.mxu1 %v1174_v25  ;;  %v1224_v25 = vld [vmem:[#allocation7 + $0x10] sm:$0xff] }
  0x30   :  { %555 = vmatpush.bf16.msra.mxu2 %v1182_v26 }
  0x31   :  { %568 = vmatpush.bf16.msra.mxu3 %v1190_v28 }
  0x32   :  { %530 = vmatpush.bf16.msra.mxu0 %v1165_v27 }
  0x33   :  { %543 = vmatpush.bf16.msra.mxu1 %v1173_v29 }
  0x34   :  { %556 = vmatpush.bf16.msra.mxu2 %v1181_v34 }
  0x35   :  { %531 = vmatmul.bf16.vlgmr.msra.gmra.mxu0 %v116_v36  ;;  %569 = vmatpush.bf16.msra.mxu3 %v1189_v38  ;;  %v1222_v38 = vld [vmem:[#allocation7] sm:$0xff] }
  0x36   :  { %575 = vmatpush.bf16.msrb.mxu0 %v1204_v32  ;;  %544 = vmatmul.bf16.vlgmr.msra.gmra.mxu1 %v117_v37  ;;  %v1223_v37 = vld [vmem:[#allocation7 + $0x8] sm:$0xff] }
  0x37   :  { %588 = vmatpush.bf16.msrb.mxu1 %v1212_v33  ;;  %557 = vmatmul.bf16.vlgmr.msra.gmra.mxu2 %v118_v43  ;;  %v1233_v43 = vld [vmem:[#allocation9 + $0x18] sm:$0xff] }
  0x38   :  { %608 = vmatpush.bf16.msrb.mxu2 %v1213_v39  ;;  %570 = vmatmul.bf16.vlgmr.msra.gmra.mxu3 %v119_v44  ;;  %v1237_v39 = vld [vmem:[#allocation9 + $0x38] sm:$0xff]  ;;  %v1232_v44 = vld [vmem:[#allocation9 + $0x10] sm:$0xff] }
  0x39   :  { %684 = vmatpush.bf16.msrb.mxu3 %v1221_v63 }
  0x3a   :  { %576 = vmatpush.bf16.msrb.mxu0 %v1203_v41  ;;  %v1235_v41 = vld [vmem:[#allocation9 + $0x28] sm:$0xff] }
  0x3b   :  { %589 = vmatpush.bf16.msrb.mxu1 %v1211_v42  ;;  %v1234_v42 = vld [vmem:[#allocation9 + $0x20] sm:$0xff] }
  0x3c   :  { %767 = vmatpush.bf16.msra.mxu2 %v1229_v11 }
  0x3d   :  { %685 = vmatpush.bf16.msrb.mxu3 %v1220_v0 }
  0x3e   :  { %577 = vmatpush.bf16.msrb.mxu0 %v1202_v45  ;;  %v1246_v45 = vld [vmem:[%s1466_s4] ss:$0 sm:$0xff] }
  0x3f   :  { %590 = vmatpush.bf16.msrb.mxu1 %v1210_v46 }
  0x40   :  { %768 = vmatpush.bf16.msra.mxu2 %v1228_v14 }
  0x41   :  { %686 = vmatpush.bf16.msrb.mxu3 %v1219_v1 }
  0x42   :  { %578 = vmatpush.bf16.msrb.mxu0 %v1201_v47 }
  0x43   :  { %591 = vmatpush.bf16.msrb.mxu1 %v1209_v48 }
  0x44   :  { %769 = vmatpush.bf16.msra.mxu2 %v1227_v16 }
  0x45   :  { %687 = vmatpush.bf16.msrb.mxu3 %v1218_v2 }
  0x46   :  { %579 = vmatpush.bf16.msrb.mxu0 %v1200_v49 }
  0x47   :  { %592 = vmatpush.bf16.msrb.mxu1 %v1208_v50  ;;  %1068 = vmatmul.msk.bf16.vlgmr.msrb.gmra.mxu2 %vm519_vm0, %v122_v54 }
  0x48   :  { %770 = vmatpush.bf16.msra.mxu2 %v1226_v20 }
  0x49   :  { %688 = vmatpush.bf16.msrb.mxu3 %v1217_v3 }
  0x4a   :  { %580 = vmatpush.bf16.msrb.mxu0 %v1199_v52  ;;  %v1230_v52 = vld [vmem:[#allocation9] sm:$0xff] }
  0x4b   :  { %593 = vmatpush.bf16.msrb.mxu1 %v1207_v53  ;;  %v1247_v53 = vld [vmem:[%s1468_s6] ss:$0 sm:$0xff] }
  0x4c   :  { %771 = vmatpush.bf16.msra.mxu2 %v1225_v22 }
  0x4d   :  { %689 = vmatpush.bf16.msrb.mxu3 %v1216_v4 }
  0x4e   :  { %581 = vmatpush.bf16.msrb.mxu0 %v1198_v55 }
  0x4f   :  { %594 = vmatpush.bf16.msrb.mxu1 %v1206_v56 }
  0x50   :  { %772 = vmatpush.bf16.msra.mxu2 %v1224_v25 }
  0x51   :  { %690 = vmatpush.bf16.msrb.mxu3 %v1215_v5 }
  0x52   :  { %582 = vmatpush.bf16.msrb.mxu0 %v1197_v57 }
  0x53   :  { %595 = vmatpush.bf16.msrb.mxu1 %v1205_v58 }
  0x54   :  { %773 = vmatpush.bf16.msra.mxu2 %v1223_v37 }
  0x55   :  { %583 = vmatmul.bf16.vlgmr.msrb.gmra.mxu0 %v120_v61  ;;  %691 = vmatpush.bf16.msrb.mxu3 %v1214_v8 }
  0x56   :  { %596 = vmatmul.bf16.vlgmr.msrb.gmra.mxu1 %v121_v62  ;;  %850 = vmatpush.bf16.msra.mxu0 %v1237_v39 }
  0x58   :  { %774 = vmatpush.bf16.msra.mxu2 %v1222_v38 }
  0x5a   :  { %851 = vmatpush.bf16.msra.mxu0 %v1236_v40 }
  0x5e   :  { %852 = vmatpush.bf16.msra.mxu0 %v1235_v41 }
  0x62   :  { %853 = vmatpush.bf16.msra.mxu0 %v1234_v42 }
  0x66   :  { %854 = vmatpush.bf16.msra.mxu0 %v1233_v43 }
  0x6a   :  { %855 = vmatpush.bf16.msra.mxu0 %v1232_v44 }
  0x6e   :  { %856 = vmatpush.bf16.msra.mxu0 %v1231_v51 }
  0x72   :  { %857 = vmatpush.bf16.msra.mxu0 %v1230_v52 }
  0xb2   :  { %v532_v6 = vpop.f32.mrf.mxu0 }
  0xb3   :  { %v545_v7 = vpop.f32.mrf.mxu1  ;;  %v533_v17 = vadd.f32 %v1245_v15, %v532_v6 }
  0xb5   :  { %v546_v21 = vadd.f32 %v545_v7, %v533_v17 }
  0xba   :  { %v534_v9 = vpop.f32.mrf.mxu0  ;;  %v558_v12 = vpop.f32.mrf.mxu2 }
  0xbb   :  { %v547_v10 = vpop.f32.mrf.mxu1  ;;  %v571_v13 = vpop.f32.mrf.mxu3  ;;  %v559_v23 = vadd.f32 %v558_v12, %v546_v21 }
  0xbd   :  { %v572_v26 = vadd.f32 %v571_v13, %v559_v23 }
  0xc2   :  { %v560_v18 = vpop.f32.mrf.mxu2 }
  0xc3   :  { %v573_v19 = vpop.f32.mrf.mxu3 }
  0xca   :  { %v610_v24 = vpop.f32.mrf.mxu2 }
  0xd2   :  { %v584_v27 = vpop.f32.mrf.mxu0  ;;  %v612_v31 = vpop.f32.mrf.mxu2 }
  0xd3   :  { %v597_v28 = vpop.f32.mrf.mxu1  ;;  %v585_v29 = vadd.f32 %v584_v27, %v572_v26 }
  0xd5   :  { %v598_v30 = vadd.f32 %v597_v28, %v585_v29 }
  0xd7   :  { %v611_v32 = vadd.f32 %v610_v24, %v598_v30 }
  0xd9   :  { %v614_v33 = vmax.f32 %v611_v32, 0.0 }
  0xda   :  { %v586_v34 = vpop.f32.mrf.mxu0 }
  0xdb   :  { %v599_v35 = vpop.f32.mrf.mxu1  ;;  %v615_v36 = vpack.c.bf16 %v614_v33, %v614_v33 }
  0xdd   :  { %692 = vmatmul.bf16.vlgmr.msrb.gmra.mxu3 %v615_v36 }
 0x160   :  { %v693_v46 = vpop.f32.mrf.mxu3 }
 0x161   :  { %v694_v47 = vadd.f32 %v1246_v45, %v693_v46 }
 0x163   :  { %v697_v48 = vmax.f32 %v694_v47, 0.0 }
 0x165   :  { %v698_v49 = vpack.c.bf16 %v697_v48, %v697_v48 }
 0x167   :  { %775 = vmatmul.bf16.vlgmr.msra.gmra.mxu2 %v698_v49 }
 0x168   :  { %v695_v50 = vpop.f32.mrf.mxu3 }
 0x1ea   :  { %v776_v54 = vpop.f32.mrf.mxu2 }
 0x1eb   :  { %v777_v55 = vadd.f32 %v1247_v53, %v776_v54 }
 0x1ed   :  { %v780_v56 = vmax.f32 %v777_v55, 0.0 }
 0x1ef   :  { %v781_v57 = vpack.c.bf16 %v780_v56, %v780_v56 }
 0x1f1   :  { %858 = vmatmul.bf16.vlgmr.msra.gmra.mxu0 %v781_v57 }
 0x1f2   :  { %v778_v58 = vpop.f32.mrf.mxu2 }
 0x26e   :  { %v859_v60 = vpop.f32.mrf.mxu0 }
 0x26f   :  { %v860_v61 = vadd.f32 %v1248_v59, %v859_v60 }
 0x271   :  { %v863_v62 = vpack.c.bf16 %v860_v61, %v860_v61 }
 0x273   :  { %864 = vst [vmem:[%s1471_s9] sm:$0xf] %v863_v62 }
 0x276   :  { %v861_v63 = vpop.f32.mrf.mxu0 }
 0x277   :  { %869 = vsyncpa [#allocation3], 1 }
 0x278   :  { %870 = vsyncpa [#allocation5], 1 }
 0x279   :  { %871 = vsyncpa [#allocation8], 1 }

// kernel: _ffnn_forward_impl.1
= control target key start
LH: loop header
LB: loop body
LE: loop exit
PB: predicated region body
PF: predicated region fallthrough
CT: control target
= control target key end

     0   :  { %14 = vsyncpa [#allocation3], 0  ;;  %s1462_s0 = inlined_call_operand.hbm [shape: f32[8,784], index: 0, kind: input, shape index: {}]   ;;  %s1463_s1 = inlined_call_operand.hbm [shape: bf16[784,128], index: 1, kind: input, shape index: {}]   ;;  %s1464_s2 = inlined_call_operand.vmem [shape: f32[1,128], index: 2, kind: input, shape index: {}]   ;;  %s1465_s3 = inlined_call_operand.hbm [shape: bf16[128,128], index: 3, kind: input, shape index: {}]   ;;  %s1466_s4 = inlined_call_operand.vmem [shape: f32[1,128], index: 4, kind: input, shape index: {}]   ;;  %s1467_s5 = inlined_call_operand.hbm [shape: bf16[128,128], index: 5, kind: input, shape index: {}]   ;;  %s1468_s6 = inlined_call_operand.vmem [shape: f32[1,128], index: 6, kind: input, shape index: {}]   ;;  %s1469_s7 = inlined_call_operand.hbm [shape: bf16[128,128], index: 7, kind: input, shape index: {}]   ;;  %s1470_s8 = inlined_call_operand.vmem [shape: f32[1,128], index: 8, kind: input, shape index: {}]   ;;  %s1471_s9 = inlined_call_operand.vmem [shape: bf16[8,128], index: 9, kind: output, shape index: {}]  }
   0x1   :  { %15 = vsyncpa [#allocation5], 0  ;;  %s32_s11 = sshll.u32 %s1463_s1, 4  ;;  %s33_s11 = int_to_ptr.hbm [resolvable:$true] %s32_s11 }
   0x2   :  { %16 = vsyncpa [#allocation8], 0  ;;  %s1375_s12 = smov [#allocation4]   ;;  %s62_s16 = sshll.u32 %s1467_s5, 4  ;;  %s63_s16 = int_to_ptr.hbm [resolvable:$true] %s62_s16 }
   0x3   :  { %s34_s13 = sshll.u32 %s1375_s12, 4  ;;  %s1376_s17 = smov 64   ;;  %s35_s13 = int_to_ptr.vmem [resolvable:$true] %s34_s13 }
   0x4   :  { %s1377_s18 = smov 4   ;;  %s1378_s19 = smov [#allocation7]  }
   0x5   :  { %40 = dma.hbm_to_vmem [thread:$0]  %s33_s11, 6272, %s35_s13, [#allocation5], %s1376_s17, %s1376_s17, %s1377_s18  }
   0x6   :  { %s64_s20 = sshll.u32 %s1378_s19, 4  ;;  %s22_s23 = sshll.u32 %s1462_s0, 4  ;;  %s65_s20 = int_to_ptr.vmem [resolvable:$true] %s64_s20  ;;  %s23_s23 = int_to_ptr.hbm [resolvable:$true] %s22_s23 }
   0x7   :  { %70 = dma.hbm_to_vmem [thread:$0]  %s63_s16, 1024, %s65_s20, [#allocation8], %s1376_s17, %s1376_s17, %s1377_s18  }
   0x8   :  { %s47_s25 = sshll.u32 %s1465_s3, 4  ;;  %s1379_s26 = smov [#allocation2]   ;;  %s48_s25 = int_to_ptr.hbm [resolvable:$true] %s47_s25 }
   0x9   :  { %s24_s27 = sshll.u32 %s1379_s26, 4  ;;  %s1380_s5 = smov [#allocation6]   ;;  %s25_s27 = int_to_ptr.vmem [resolvable:$true] %s24_s27 }
   0xa   :  { %27 = dma.hbm_to_vmem [thread:$0]  %s23_s23, 896, %s25_s27, [#allocation3]  }
   0xb   :  { %s49_s28 = sshll.u32 %s1380_s5, 4  ;;  %s77_s10 = sshll.u32 %s1469_s7, 4  ;;  %s50_s28 = int_to_ptr.vmem [resolvable:$true] %s49_s28  ;;  %s78_s10 = int_to_ptr.hbm [resolvable:$true] %s77_s10 }
   0xc   :  { %55 = dma.hbm_to_vmem [thread:$0]  %s48_s25, 1024, %s50_s28, [#allocation5], %s1376_s17, %s1376_s17, %s1377_s18  }
   0xd   :  { %s1381_s0 = smov [#allocation9]  }
   0xe   :  { %s79_s11 = sshll.u32 %s1381_s0, 4  ;;  %s80_s11 = int_to_ptr.vmem [resolvable:$true] %s79_s11 }
   0xf   :  { %85 = dma.hbm_to_vmem [thread:$0]  %s78_s10, 1024, %s80_s11, [#allocation8], %s1376_s17, %s1376_s17, %s1377_s18  }
  0x10   :  { %1369 = dma.done.wait [#allocation3], 896  }
  0x11   :  { %1370 = vsyncadd [#allocation3], 4294966400 }
  0x12   :  { %1371 = dma.done.wait [#allocation5], 7296  }
  0x13   :  { %1372 = vsyncadd [#allocation5], 4294960000 }
  0x14   :  { %1373 = dma.done.wait [#allocation8], 2048  }
  0x15   :  { %1374 = vsyncadd [#allocation8], 4294965248  ;;  %v1172_v0 = vld [vmem:[#allocation4 + $0x38] sm:$0xff]  ;;  %v1171_v3 = vld [vmem:[#allocation4 + $0x30] sm:$0xff]  ;;  %vm519_vm0 = vcmask 130048  }
  0x16   :  { %v1180_v1 = vld [vmem:[#allocation4 + $0x78] sm:$0xff]  ;;  %523 = vmatpush.bf16.msra.mxu0 %v1172_v0  ;;  %v1179_v4 = vld [vmem:[#allocation4 + $0x70] sm:$0xff]  ;;  %v1170_v8 = vld [vmem:[#allocation4 + $0x28] sm:$0xff] }
  0x17   :  { %v1188_v2 = vld [vmem:[#allocation4 + $0xb8] sm:$0xff]  ;;  %536 = vmatpush.bf16.msra.mxu1 %v1180_v1  ;;  %v1187_v5 = vld [vmem:[#allocation4 + $0xb0] sm:$0xff]  ;;  %v1178_v9 = vld [vmem:[#allocation4 + $0x68] sm:$0xff] }
  0x18   :  { %549 = vmatpush.bf16.msra.mxu2 %v1188_v2  ;;  %v1196_v6 = vld [vmem:[#allocation4 + $0xf8] sm:$0xff]  ;;  %v1195_v7 = vld [vmem:[#allocation4 + $0xf0] sm:$0xff]  ;;  %v1186_v10 = vld [vmem:[#allocation4 + $0xa8] sm:$0xff] }
  0x19   :  { %562 = vmatpush.bf16.msra.mxu3 %v1196_v6  ;;  %v1194_v11 = vld [vmem:[#allocation4 + $0xe8] sm:$0xff]  ;;  %v1169_v12 = vld [vmem:[#allocation4 + $0x20] sm:$0xff]  ;;  %v1168_v16 = vld [vmem:[#allocation4 + $0x18] sm:$0xff] }
  0x1a   :  { %524 = vmatpush.bf16.msra.mxu0 %v1171_v3  ;;  %v1177_v13 = vld [vmem:[#allocation4 + $0x60] sm:$0xff]  ;;  %v1176_v17 = vld [vmem:[#allocation4 + $0x58] sm:$0xff]  ;;  %v1167_v20 = vld [vmem:[#allocation4 + $0x10] sm:$0xff] }
  0x1b   :  { %537 = vmatpush.bf16.msra.mxu1 %v1179_v4  ;;  %v1185_v14 = vld [vmem:[#allocation4 + $0xa0] sm:$0xff]  ;;  %v1184_v18 = vld [vmem:[#allocation4 + $0x98] sm:$0xff]  ;;  %v1175_v21 = vld [vmem:[#allocation4 + $0x50] sm:$0xff] }
  0x1c   :  { %550 = vmatpush.bf16.msra.mxu2 %v1187_v5  ;;  %v1193_v15 = vld [vmem:[#allocation4 + $0xe0] sm:$0xff]  ;;  %v1192_v19 = vld [vmem:[#allocation4 + $0xd8] sm:$0xff]  ;;  %v1183_v22 = vld [vmem:[#allocation4 + $0x90] sm:$0xff] }
  0x1d   :  { %563 = vmatpush.bf16.msra.mxu3 %v1195_v7  ;;  %v1191_v23 = vld [vmem:[#allocation4 + $0xd0] sm:$0xff]  ;;  %v1166_v24 = vld [vmem:[#allocation4 + $0x8] sm:$0xff]  ;;  %v1165_v27 = vld [vmem:[#allocation4] sm:$0xff] }
  0x1e   :  { %525 = vmatpush.bf16.msra.mxu0 %v1170_v8  ;;  %v1174_v25 = vld [vmem:[#allocation4 + $0x48] sm:$0xff]  ;;  %v1173_v29 = vld [vmem:[#allocation4 + $0x40] sm:$0xff]  ;;  %v110_v31 = vld [vmem:[#allocation2 + $0x8] sm:$0xff] }
  0x1f   :  { %538 = vmatpush.bf16.msra.mxu1 %v1178_v9  ;;  %v1182_v26 = vld [vmem:[#allocation4 + $0x88] sm:$0xff]  ;;  %v1204_v32 = vld [vmem:[#allocation4 + $0x138] sm:$0xff]  ;;  %v1181_v34 = vld [vmem:[#allocation4 + $0x80] sm:$0xff]  ;;  %v117_v37 = vpack.c.bf16 %v110_v31, %v110_v31 }
  0x20   :  { %551 = vmatpush.bf16.msra.mxu2 %v1186_v10  ;;  %v1190_v28 = vld [vmem:[#allocation4 + $0xc8] sm:$0xff]  ;;  %v1212_v33 = vld [vmem:[#allocation4 + $0x178] sm:$0xff]  ;;  %v1189_v38 = vld [vmem:[#allocation4 + $0xc0] sm:$0xff] }
  0x21   :  { %564 = vmatpush.bf16.msra.mxu3 %v1194_v11  ;;  %v109_v30 = vld [vmem:[#allocation2] sm:$0xff]  ;;  %v111_v35 = vld [vmem:[#allocation2 + $0x10] sm:$0xff]  ;;  %v1213_v39 = vld [vmem:[#allocation4 + $0x180] sm:$0xff] }
  0x22   :  { %526 = vmatpush.bf16.msra.mxu0 %v1169_v12  ;;  %v116_v36 = vpack.c.bf16 %v109_v30, %v109_v30  ;;  %v112_v40 = vld [vmem:[#allocation2 + $0x18] sm:$0xff]  ;;  %v1203_v41 = vld [vmem:[#allocation4 + $0x130] sm:$0xff]  ;;  %v118_v43 = vpack.c.bf16 %v111_v35, %v111_v35  ;;  %v1202_v45 = vld [vmem:[#allocation4 + $0x128] sm:$0xff] }
  0x23   :  { %539 = vmatpush.bf16.msra.mxu1 %v1177_v13  ;;  %v1211_v42 = vld [vmem:[#allocation4 + $0x170] sm:$0xff]  ;;  %v119_v44 = vpack.c.bf16 %v112_v40, %v112_v40  ;;  %v1210_v46 = vld [vmem:[#allocation4 + $0x168] sm:$0xff]  ;;  %v1201_v47 = vld [vmem:[#allocation4 + $0x120] sm:$0xff] }
  0x24   :  { %552 = vmatpush.bf16.msra.mxu2 %v1185_v14  ;;  %v1209_v48 = vld [vmem:[#allocation4 + $0x160] sm:$0xff]  ;;  %v1200_v49 = vld [vmem:[#allocation4 + $0x118] sm:$0xff]  ;;  %v1199_v52 = vld [vmem:[#allocation4 + $0x110] sm:$0xff] }
  0x25   :  { %565 = vmatpush.bf16.msra.mxu3 %v1193_v15  ;;  %v1208_v50 = vld [vmem:[#allocation4 + $0x158] sm:$0xff]  ;;  %v1207_v53 = vld [vmem:[#allocation4 + $0x150] sm:$0xff]  ;;  %v1198_v55 = vld [vmem:[#allocation4 + $0x108] sm:$0xff] }
  0x26   :  { %527 = vmatpush.bf16.msra.mxu0 %v1168_v16  ;;  %v115_v51 = vld [vmem:[#allocation2 + $0x30] sm:$0xff]  ;;  %v1206_v56 = vld [vmem:[#allocation4 + $0x148] sm:$0xff]  ;;  %v1197_v57 = vld [vmem:[#allocation4 + $0x100] sm:$0xff] }
  0x27   :  { %540 = vmatpush.bf16.msra.mxu1 %v1176_v17  ;;  %v122_v54 = vpack.c.bf16 %v115_v51, %v115_v51  ;;  %v1205_v58 = vld [vmem:[#allocation4 + $0x140] sm:$0xff]  ;;  %v113_v59 = vld [vmem:[#allocation2 + $0x20] sm:$0xff]  ;;  %v114_v60 = vld [vmem:[#allocation2 + $0x28] sm:$0xff] }
  0x28   :  { %553 = vmatpush.bf16.msra.mxu2 %v1184_v18  ;;  %v120_v61 = vpack.c.bf16 %v113_v59, %v113_v59  ;;  %v121_v62 = vpack.c.bf16 %v114_v60, %v114_v60  ;;  %v1221_v63 = vld [vmem:[#allocation6 + $0x38] sm:$0xff]  ;;  %v1220_v0 = vld [vmem:[#allocation6 + $0x30] sm:$0xff]  ;;  %v1219_v1 = vld [vmem:[#allocation6 + $0x28] sm:$0xff] }
  0x29   :  { %566 = vmatpush.bf16.msra.mxu3 %v1192_v19  ;;  %v1218_v2 = vld [vmem:[#allocation6 + $0x20] sm:$0xff]  ;;  %v1217_v3 = vld [vmem:[#allocation6 + $0x18] sm:$0xff]  ;;  %v1216_v4 = vld [vmem:[#allocation6 + $0x10] sm:$0xff] }
  0x2a   :  { %528 = vmatpush.bf16.msra.mxu0 %v1167_v20  ;;  %v1215_v5 = vld [vmem:[#allocation6 + $0x8] sm:$0xff]  ;;  %v1214_v8 = vld [vmem:[#allocation6] sm:$0xff]  ;;  %v1229_v11 = vld [vmem:[#allocation7 + $0x38] sm:$0xff] }
  0x2b   :  { %541 = vmatpush.bf16.msra.mxu1 %v1175_v21  ;;  %v1228_v14 = vld [vmem:[#allocation7 + $0x30] sm:$0xff]  ;;  %v1245_v15 = vld [vmem:[%s1464_s2] ss:$0 sm:$0xff]  ;;  %v1227_v16 = vld [vmem:[#allocation7 + $0x28] sm:$0xff] }
  0x2c   :  { %554 = vmatpush.bf16.msra.mxu2 %v1183_v22  ;;  %v1226_v20 = vld [vmem:[#allocation7 + $0x20] sm:$0xff]  ;;  %v1225_v22 = vld [vmem:[#allocation7 + $0x18] sm:$0xff]  ;;  %v1236_v40 = vld [vmem:[#allocation9 + $0x30] sm:$0xff] }
  0x2d   :  { %567 = vmatpush.bf16.msra.mxu3 %v1191_v23  ;;  %v1231_v51 = vld [vmem:[#allocation9 + $0x8] sm:$0xff]  ;;  %v1248_v59 = vld [vmem:[%s1470_s8] ss:$0 sm:$0xff] }
  0x2e   :  { %529 = vmatpush.bf16.msra.mxu0 %v1166_v24 }
  0x2f   :  { %542 = vmatpush.bf16.msra.mxu1 %v1174_v25  ;;  %v1224_v25 = vld [vmem:[#allocation7 + $0x10] sm:$0xff] }
  0x30   :  { %555 = vmatpush.bf16.msra.mxu2 %v1182_v26 }
  0x31   :  { %568 = vmatpush.bf16.msra.mxu3 %v1190_v28 }
  0x32   :  { %530 = vmatpush.bf16.msra.mxu0 %v1165_v27 }
  0x33   :  { %543 = vmatpush.bf16.msra.mxu1 %v1173_v29 }
  0x34   :  { %556 = vmatpush.bf16.msra.mxu2 %v1181_v34 }
  0x35   :  { %531 = vmatmul.bf16.vlgmr.msra.gmra.mxu0 %v116_v36  ;;  %569 = vmatpush.bf16.msra.mxu3 %v1189_v38  ;;  %v1222_v38 = vld [vmem:[#allocation7] sm:$0xff] }
  0x36   :  { %575 = vmatpush.bf16.msrb.mxu0 %v1204_v32  ;;  %544 = vmatmul.bf16.vlgmr.msra.gmra.mxu1 %v117_v37  ;;  %v1223_v37 = vld [vmem:[#allocation7 + $0x8] sm:$0xff] }
  0x37   :  { %588 = vmatpush.bf16.msrb.mxu1 %v1212_v33  ;;  %557 = vmatmul.bf16.vlgmr.msra.gmra.mxu2 %v118_v43  ;;  %v1233_v43 = vld [vmem:[#allocation9 + $0x18] sm:$0xff] }
  0x38   :  { %608 = vmatpush.bf16.msrb.mxu2 %v1213_v39  ;;  %570 = vmatmul.bf16.vlgmr.msra.gmra.mxu3 %v119_v44  ;;  %v1237_v39 = vld [vmem:[#allocation9 + $0x38] sm:$0xff]  ;;  %v1232_v44 = vld [vmem:[#allocation9 + $0x10] sm:$0xff] }
  0x39   :  { %684 = vmatpush.bf16.msrb.mxu3 %v1221_v63 }
  0x3a   :  { %576 = vmatpush.bf16.msrb.mxu0 %v1203_v41  ;;  %v1235_v41 = vld [vmem:[#allocation9 + $0x28] sm:$0xff] }
  0x3b   :  { %589 = vmatpush.bf16.msrb.mxu1 %v1211_v42  ;;  %v1234_v42 = vld [vmem:[#allocation9 + $0x20] sm:$0xff] }
  0x3c   :  { %767 = vmatpush.bf16.msra.mxu2 %v1229_v11 }
  0x3d   :  { %685 = vmatpush.bf16.msrb.mxu3 %v1220_v0 }
  0x3e   :  { %577 = vmatpush.bf16.msrb.mxu0 %v1202_v45  ;;  %v1246_v45 = vld [vmem:[%s1466_s4] ss:$0 sm:$0xff] }
  0x3f   :  { %590 = vmatpush.bf16.msrb.mxu1 %v1210_v46 }
  0x40   :  { %768 = vmatpush.bf16.msra.mxu2 %v1228_v14 }
  0x41   :  { %686 = vmatpush.bf16.msrb.mxu3 %v1219_v1 }
  0x42   :  { %578 = vmatpush.bf16.msrb.mxu0 %v1201_v47 }
  0x43   :  { %591 = vmatpush.bf16.msrb.mxu1 %v1209_v48 }
  0x44   :  { %769 = vmatpush.bf16.msra.mxu2 %v1227_v16 }
  0x45   :  { %687 = vmatpush.bf16.msrb.mxu3 %v1218_v2 }
  0x46   :  { %579 = vmatpush.bf16.msrb.mxu0 %v1200_v49 }
  0x47   :  { %592 = vmatpush.bf16.msrb.mxu1 %v1208_v50  ;;  %1068 = vmatmul.msk.bf16.vlgmr.msrb.gmra.mxu2 %vm519_vm0, %v122_v54 }
  0x48   :  { %770 = vmatpush.bf16.msra.mxu2 %v1226_v20 }
  0x49   :  { %688 = vmatpush.bf16.msrb.mxu3 %v1217_v3 }
  0x4a   :  { %580 = vmatpush.bf16.msrb.mxu0 %v1199_v52  ;;  %v1230_v52 = vld [vmem:[#allocation9] sm:$0xff] }
  0x4b   :  { %593 = vmatpush.bf16.msrb.mxu1 %v1207_v53  ;;  %v1247_v53 = vld [vmem:[%s1468_s6] ss:$0 sm:$0xff] }
  0x4c   :  { %771 = vmatpush.bf16.msra.mxu2 %v1225_v22 }
  0x4d   :  { %689 = vmatpush.bf16.msrb.mxu3 %v1216_v4 }
  0x4e   :  { %581 = vmatpush.bf16.msrb.mxu0 %v1198_v55 }
  0x4f   :  { %594 = vmatpush.bf16.msrb.mxu1 %v1206_v56 }
  0x50   :  { %772 = vmatpush.bf16.msra.mxu2 %v1224_v25 }
  0x51   :  { %690 = vmatpush.bf16.msrb.mxu3 %v1215_v5 }
  0x52   :  { %582 = vmatpush.bf16.msrb.mxu0 %v1197_v57 }
  0x53   :  { %595 = vmatpush.bf16.msrb.mxu1 %v1205_v58 }
  0x54   :  { %773 = vmatpush.bf16.msra.mxu2 %v1223_v37 }
  0x55   :  { %583 = vmatmul.bf16.vlgmr.msrb.gmra.mxu0 %v120_v61  ;;  %691 = vmatpush.bf16.msrb.mxu3 %v1214_v8 }
  0x56   :  { %596 = vmatmul.bf16.vlgmr.msrb.gmra.mxu1 %v121_v62  ;;  %850 = vmatpush.bf16.msra.mxu0 %v1237_v39 }
  0x58   :  { %774 = vmatpush.bf16.msra.mxu2 %v1222_v38 }
  0x5a   :  { %851 = vmatpush.bf16.msra.mxu0 %v1236_v40 }
  0x5e   :  { %852 = vmatpush.bf16.msra.mxu0 %v1235_v41 }
  0x62   :  { %853 = vmatpush.bf16.msra.mxu0 %v1234_v42 }
  0x66   :  { %854 = vmatpush.bf16.msra.mxu0 %v1233_v43 }
  0x6a   :  { %855 = vmatpush.bf16.msra.mxu0 %v1232_v44 }
  0x6e   :  { %856 = vmatpush.bf16.msra.mxu0 %v1231_v51 }
  0x72   :  { %857 = vmatpush.bf16.msra.mxu0 %v1230_v52 }
  0xb2   :  { %v532_v6 = vpop.f32.mrf.mxu0 }
  0xb3   :  { %v545_v7 = vpop.f32.mrf.mxu1  ;;  %v533_v17 = vadd.f32 %v1245_v15, %v532_v6 }
  0xb5   :  { %v546_v21 = vadd.f32 %v545_v7, %v533_v17 }
  0xba   :  { %v534_v9 = vpop.f32.mrf.mxu0  ;;  %v558_v12 = vpop.f32.mrf.mxu2 }
  0xbb   :  { %v547_v10 = vpop.f32.mrf.mxu1  ;;  %v571_v13 = vpop.f32.mrf.mxu3  ;;  %v559_v23 = vadd.f32 %v558_v12, %v546_v21 }
  0xbd   :  { %v572_v26 = vadd.f32 %v571_v13, %v559_v23 }
  0xc2   :  { %v560_v18 = vpop.f32.mrf.mxu2 }
  0xc3   :  { %v573_v19 = vpop.f32.mrf.mxu3 }
  0xca   :  { %v610_v24 = vpop.f32.mrf.mxu2 }
  0xd2   :  { %v584_v27 = vpop.f32.mrf.mxu0  ;;  %v612_v31 = vpop.f32.mrf.mxu2 }
  0xd3   :  { %v597_v28 = vpop.f32.mrf.mxu1  ;;  %v585_v29 = vadd.f32 %v584_v27, %v572_v26 }
  0xd5   :  { %v598_v30 = vadd.f32 %v597_v28, %v585_v29 }
  0xd7   :  { %v611_v32 = vadd.f32 %v610_v24, %v598_v30 }
  0xd9   :  { %v614_v33 = vmax.f32 %v611_v32, 0.0 }
  0xda   :  { %v586_v34 = vpop.f32.mrf.mxu0 }
  0xdb   :  { %v599_v35 = vpop.f32.mrf.mxu1  ;;  %v615_v36 = vpack.c.bf16 %v614_v33, %v614_v33 }
  0xdd   :  { %692 = vmatmul.bf16.vlgmr.msrb.gmra.mxu3 %v615_v36 }
 0x160   :  { %v693_v46 = vpop.f32.mrf.mxu3 }
 0x161   :  { %v694_v47 = vadd.f32 %v1246_v45, %v693_v46 }
 0x163   :  { %v697_v48 = vmax.f32 %v694_v47, 0.0 }
 0x165   :  { %v698_v49 = vpack.c.bf16 %v697_v48, %v697_v48 }
 0x167   :  { %775 = vmatmul.bf16.vlgmr.msra.gmra.mxu2 %v698_v49 }
 0x168   :  { %v695_v50 = vpop.f32.mrf.mxu3 }
 0x1ea   :  { %v776_v54 = vpop.f32.mrf.mxu2 }
 0x1eb   :  { %v777_v55 = vadd.f32 %v1247_v53, %v776_v54 }
 0x1ed   :  { %v780_v56 = vmax.f32 %v777_v55, 0.0 }
 0x1ef   :  { %v781_v57 = vpack.c.bf16 %v780_v56, %v780_v56 }
 0x1f1   :  { %858 = vmatmul.bf16.vlgmr.msra.gmra.mxu0 %v781_v57 }
 0x1f2   :  { %v778_v58 = vpop.f32.mrf.mxu2 }
 0x26e   :  { %v859_v60 = vpop.f32.mrf.mxu0 }
 0x26f   :  { %v860_v61 = vadd.f32 %v1248_v59, %v859_v60 }
 0x271   :  { %v863_v62 = vpack.c.bf16 %v860_v61, %v860_v61 }
 0x273   :  { %864 = vst [vmem:[%s1471_s9] sm:$0xf] %v863_v62 }
 0x276   :  { %v861_v63 = vpop.f32.mrf.mxu0 }
 0x277   :  { %869 = vsyncpa [#allocation3], 1 }
 0x278   :  { %870 = vsyncpa [#allocation5], 1 }
 0x279   :  { %871 = vsyncpa [#allocation8], 1 }

</bundles_post_ra>
